<compile_context>
chip_gen: v5e
topology: v5e:2x2
jax: 0.10.0
libtpu: 0.0.40
codegen_flags: <defaults>
</compile_context>

<pallas_src>
import jax
import jax.numpy as jnp
from jax.experimental import pallas as pl
from jax.experimental.pallas import tpu as pltpu

_LANE = 128
_SUBLANE = 8
_MAX_WIDTH_UNITS = 32                    # cap lane dim at 32 * 128 = 4096
_TARGET_BLOCK_BYTES = 4 * 1024 * 1024    # ~4 MiB per block buffer
_VMEM_LIMIT_BYTES = 40 * 1024 * 1024     # explicit scoped VMEM (covers v5e's 16 MiB default,
                                         # stays well under v7x's 64 MiB physical)
_MIN_SPLIT_BYTES = 1 * 1024 * 1024       # arrays past 1 MiB get >= _MIN_GRID_STEPS steps
_MIN_GRID_STEPS = 4
_RAGGED_1D_BLOCK = 64 * 1024             # elements per block in the ragged 1-D path (mult of 128)


def _plus_one_kernel(x_ref, o_ref):
    # Elementwise hot path: scalar-immediate VPU add in the input dtype
    # (matches torch's x + ones(x.size()).type_as(x); no ones tile materialized).
    o_ref[...] = x_ref[...] + jnp.asarray(1, dtype=x_ref.dtype)


def _launch(x2d, grid, block_shape, index_map):
    """Generic 1-axis-grid elementwise launch over a 2-D slab."""
    n = x2d.size
    itemsize = jnp.dtype(x2d.dtype).itemsize
    return pl.pallas_call(
        _plus_one_kernel,
        out_shape=jax.ShapeDtypeStruct(x2d.shape, x2d.dtype),
        grid_spec=pltpu.PrefetchScalarGridSpec(
            num_scalar_prefetch=0,
            grid=grid,
            in_specs=[pl.BlockSpec(block_shape, index_map)],
            out_specs=pl.BlockSpec(block_shape, index_map),
        ),
        compiler_params=pltpu.CompilerParams(
            dimension_semantics=("parallel",) * len(grid),
            vmem_limit_bytes=_VMEM_LIMIT_BYTES,
        ),
        cost_estimate=pl.CostEstimate(
            flops=n, bytes_accessed=2 * n * itemsize, transcendentals=0
        ),
    )(x2d)


def _pick_block_rows(rows, padded_width, itemsize, sublane, total_bytes):
    """Row-block size budgeted against the lane-PADDED VMEM footprint."""
    rows_per_block = max(1, _TARGET_BLOCK_BYTES // (padded_width * itemsize))
    rows_per_block = max(sublane, (rows_per_block // sublane) * sublane)
    block_rows = min(rows, rows_per_block)
    # For arrays past ~1 MiB, force >= 4 grid steps so both v7x TensorCores
    # engage and the in-DMA of step i+1 overlaps the out-DMA of step i-1.
    if total_bytes > _MIN_SPLIT_BYTES and pl.cdiv(rows, block_rows) < _MIN_GRID_STEPS:
        cap = max(sublane, ((rows // _MIN_GRID_STEPS) // sublane) * sublane)
        block_rows = min(block_rows, cap)
    return block_rows


def plus(x):
    """x + ones_like(x), matching torch `x + torch.ones(x.size()).type_as(x)`."""
    orig_shape = x.shape
    dtype = x.dtype
    n = x.size
    if n == 0:
        return x

    itemsize = jnp.dtype(dtype).itemsize
    sublane = max(_SUBLANE, 32 // itemsize)   # 8 for f32, 16 for bf16, 32 for int8
    total_bytes = n * itemsize

    if n % _LANE == 0:
        # ---- fast lane-dense path: pure reshape (no pad, no slice) ----
        m = n // _LANE
        width_units = 1
        for k in range(min(m, _MAX_WIDTH_UNITS), 0, -1):
            if m % k == 0:
                width_units = k
                break
        width = _LANE * width_units
        rows = n // width
        x2d = jnp.reshape(x, (rows, width))
        block_rows = _pick_block_rows(rows, width, itemsize, sublane, total_bytes)
        out2d = _launch(
            x2d, (pl.cdiv(rows, block_rows),), (block_rows, width), lambda i: (i, 0)
        )
        return jnp.reshape(out2d, orig_shape)

    if x.ndim >= 2 and n // orig_shape[-1] > 1:
        # ---- ragged fallback: full-extent (possibly masked) lane dim ----
        width = orig_shape[-1]
        rows = n // width
        x2d = jnp.reshape(x, (rows, width))
        padded_width = pl.cdiv(width, _LANE) * _LANE   # lane-padded VMEM accounting
        block_rows = _pick_block_rows(rows, padded_width, itemsize, sublane, total_bytes)
        out2d = _launch(
            x2d, (pl.cdiv(rows, block_rows),), (block_rows, width), lambda i: (i, 0)
        )
        return jnp.reshape(out2d, orig_shape)

    # ---- 1-D / tiny ragged path: blocked (1, n) launch, masked final block ----
    # TODO(synk): a (1, W) block only fills 1 of 8 sublanes per vreg; for huge
    # ragged 1-D arrays a split into a lane-dense body + small tail would be denser.
    flat = jnp.reshape(x, (1, n))
    block_w = n if n <= _RAGGED_1D_BLOCK else _RAGGED_1D_BLOCK  # mult of 128 when < n
    out = _launch(flat, (pl.cdiv(n, block_w),), (1, block_w), lambda i: (0, i))
    return jnp.reshape(out, orig_shape)


if __name__ == "__main__":
    key = jax.random.PRNGKey(0)
    k0, k1, k2, k3, k4 = jax.random.split(key, 5)

    # Primary small NCHW input consistent with a typical conv-net feature map.
    x = jax.random.normal(k0, (2, 4, 16, 16), dtype=jnp.float32)
    y = plus(x)
    jax.block_until_ready(y)
    assert y.shape == x.shape and y.dtype == x.dtype
    assert jnp.allclose(y, x + jnp.ones_like(x)), "mismatch vs reference (small f32)"

    # Multi-block streaming path (grid split into >= 4 steps): 4 MiB f32 input.
    x_big = jax.random.normal(k1, (4, 16, 128, 128), dtype=jnp.float32)
    y_big = plus(x_big)
    jax.block_until_ready(y_big)
    assert jnp.allclose(y_big, x_big + 1.0), "mismatch vs reference (big f32)"

    # bf16 path: kernel adds in bf16 (same semantics as torch type_as), so the
    # reference is computed in bf16 and compared with bf16-level tolerance.
    x_bf = jax.random.normal(k2, (2, 4, 16, 16), dtype=jnp.bfloat16)
    y_bf = plus(x_bf)
    jax.block_until_ready(y_bf)
    assert y_bf.dtype == jnp.bfloat16
    ref_bf = (x_bf + jnp.ones_like(x_bf)).astype(jnp.float32)
    assert jnp.allclose(
        y_bf.astype(jnp.float32), ref_bf, rtol=1e-2, atol=1e-2
    ), "mismatch vs reference (bf16)"

    # Ragged 2-D fallback (narrow, non-multiple-of-128 last dim).
    x_rag = jax.random.normal(k3, (5, 7, 9), dtype=jnp.float32)
    y_rag = plus(x_rag)
    jax.block_until_ready(y_rag)
    assert jnp.allclose(y_rag, x_rag + 1.0), "mismatch vs reference (ragged 2D)"

    # Ragged 1-D fallback.
    x_1d = jax.random.normal(k4, (333,), dtype=jnp.float32)
    y_1d = plus(x_1d)
    jax.block_until_ready(y_1d)
    assert jnp.allclose(y_1d, x_1d + 1.0), "mismatch vs reference (1-D)"

    print("KERNEL_OK")
</pallas_src>

<mosaic_0001>
module attributes {stable_mosaic.version = 11 : i64} {
  func.func @_plus_one_kernel(%arg0: i32, %arg1: memref<1x2048xf32, #tpu.memory_space<vmem>>, %arg2: memref<1x2048xf32, #tpu.memory_space<vmem>>) attributes {dimension_semantics = [#tpu.dimension_semantics<parallel>], iteration_bounds = array<i64: 1>, scalar_prefetch = 0 : i64, scratch_operands = 0 : i64, tpu.core_type = #tpu.core_type<tc>, window_params = [{transform_indices = @transform_0, window_bounds = array<i64: 1, 2048>}, {transform_indices = @transform_1, window_bounds = array<i64: 1, 2048>}]} {
    %c0 = arith.constant 0 : index
    %c0_0 = arith.constant 0 : index
    %0 = vector.load %arg1[%c0, %c0_0] : memref<1x2048xf32, #tpu.memory_space<vmem>>, vector<1x2048xf32>
    %cst = arith.constant 1.000000e+00 : f32
    %1 = vector.broadcast %cst : f32 to vector<1x2048xf32>
    %2 = arith.addf %0, %1 : vector<1x2048xf32>
    %c0_1 = arith.constant 0 : index
    %c0_2 = arith.constant 0 : index
    %3 = vector.load %arg2[%c0_1, %c0_2] : memref<1x2048xf32, #tpu.memory_space<vmem>>, vector<1x2048xf32>
    tpu.vector_store %arg2[%c0_1, %c0_2], %2 {strides = array<i32>} : memref<1x2048xf32, #tpu.memory_space<vmem>>, vector<1x2048xf32>,
    return
  }
  func.func @transform_0(%arg0: i32) -> (i32, i32) {
    %c0_i32 = arith.constant 0 : i32
    %c0_i32_0 = arith.constant 0 : i32
    return %arg0, %c0_i32 : i32, i32
  }
  func.func @transform_1(%arg0: i32) -> (i32, i32) {
    %c0_i32 = arith.constant 0 : i32
    %c0_i32_0 = arith.constant 0 : i32
    return %arg0, %c0_i32 : i32, i32
  }
}

</mosaic_0001>

<bundles_post_ra>
// kernel: tpu_custom_call.1
= control target key start
LH: loop header
LB: loop body
LE: loop exit
PB: predicated region body
PF: predicated region fallthrough
CT: control target
= control target key end

     0   :  { %6 = vsyncpa [#allocation3], 0  ;;  %s118_s0 = inlined_call_operand.hbm [shape: f32[1,2048], index: 0, kind: input, shape index: {}]   ;;  %s119_s1 = inlined_call_operand.hbm [shape: f32[1,2048], index: 1, kind: output, shape index: {}]  }
   0x1   :  { %7 = vsyncpa [#allocation4], 0  ;;  %s13_s8 = sshll.u32 %s118_s0, 4  ;;  %s100_s9 = smov [#allocation2]   ;;  %s14_s8 = int_to_ptr.hbm [resolvable:$true] %s13_s8 }
   0x2   :  { %s15_s10 = sshll.u32 %s100_s9, 4  ;;  %s16_s10 = int_to_ptr.vmem [resolvable:$true] %s15_s10 }
   0x3   :  { %18 = dma.hbm_to_vmem [thread:$0]  %s14_s8, 256, %s16_s10, [#allocation3]  }
   0x4   :  { %96 = dma.done.wait [#allocation3], 256  }
   0x5   :  { %97 = vsyncadd [#allocation3], 4294967040  ;;  %s101_s11 = smov [#allocation5]   ;;  %s36_s15 = sshll.u32 %s119_s1, 4  ;;  %v23_v0 = vld [vmem:[#allocation2] sm:$0xff]  ;;  %v24_v1 = vld [vmem:[#allocation2 + $0x8] sm:$0xff]  ;;  %s37_s15 = int_to_ptr.hbm [resolvable:$true] %s36_s15 }
   0x6   :  { %s34_s12 = sshll.u32 %s101_s11, 4  ;;  %v25_v2 = vadd.f32 1.0, %v23_v0  ;;  %v26_v3 = vadd.f32 1.0, %v24_v1  ;;  %s35_s12 = int_to_ptr.vmem [resolvable:$true] %s34_s12 }
   0x8   :  { %27 = vst [vmem:[#allocation5] sm:$0xff] %v25_v2 }
   0x9   :  { %28 = vst [vmem:[#allocation5 + $0x8] sm:$0xff] %v26_v3 }
   0xa   :  { %39 = dma.vmem_to_hbm [thread:$0]  %s35_s12, 256, %s37_s15, [#allocation4]  }
   0xb   :  { %98 = dma.done.wait [#allocation4], 256  }
   0xc   :  { %99 = vsyncadd [#allocation4], 4294967040 }
   0xd   :  { %44 = vsyncpa [#allocation3], 1 }
   0xe   :  { %45 = vsyncpa [#allocation4], 1 }

</bundles_post_ra>
